<compile_context>
chip_gen: v5e
topology: v5e:2x2
jax: 0.10.0
libtpu: 0.0.40
codegen_flags: <defaults>
</compile_context>

<pallas_src>
import functools
import math

import jax
import jax.numpy as jnp
from jax.experimental import pallas as pl
from jax.experimental.pallas import tpu as pltpu


def _attention_kernel(x_ref, w_ref, b_ref, vec_ref, probs_ref):
    # x_ref:     (T, ncol)  lane-dense slab, ncol = block_b * D
    # w_ref:     (T, T)     Linear weight (shared across the grid)
    # b_ref:     (T, 1)     Linear bias as a column vector
    # vec_ref:   (1, ncol)  attention_vec slab
    # probs_ref: (T, ncol)  attention_probs slab
    x = x_ref[...]
    w = w_ref[...]
    b = b_ref[...]

    # One MXU matmul with N = ncol (>= 128): the Linear along the T axis applied
    # to every (batch, feature) column of the block at once.
    logits = jnp.dot(w, x, preferred_element_type=jnp.float32) + b    # (T, ncol)

    # Softmax over T (== PyTorch softmax over dim=-1 in the (B, D, T) layout).
    m = jnp.max(logits, axis=0, keepdims=True)            # (1, ncol)
    e = jnp.exp(logits - m)                                # (T, ncol)
    denom = jnp.sum(e, axis=0, keepdims=True)              # (1, ncol)
    # Approximate reciprocal runs on the EUP slot (essentially free) and lets the
    # weighted sum be formed from the un-normalized accumulator.
    inv = pl.reciprocal(denom, approx=True)                # (1, ncol)

    probs_ref[...] = (e * inv).astype(probs_ref.dtype)
    vec_ref[...] = (jnp.sum(e * x, axis=0, keepdims=True) * inv).astype(vec_ref.dtype)


def _pick_block_b(B, T, D, vmem_budget_bytes=4 << 20):
    """Pick a batch block so block_b*D is a multiple of 128 lanes and the
    double-buffered x/probs tiles stay well under the scoped VMEM budget
    (sized against v7x: 32 MiB scoped / 64 MiB physical VMEM, with headroom)."""
    base = 128 // math.gcd(D, 128)         # min block_b for lane-dense columns
    bytes_per_batch = 2 * 2 * T * D * 4    # (x + probs) tiles x double-buffer, f32
    cap = max(base, (vmem_budget_bytes // bytes_per_batch) // base * base)
    padded_b = -(-B // base) * base
    return min(cap, padded_b)


@functools.partial(jax.jit, static_argnames=("block_b",))
def attention_block(x, w, b, *, block_b=None):
    """x: (B, T, D), w: (T, T), b: (T,).

    Returns (attention_vec (B, D), attention_probs (B, T, D)),
    matching AttentionBlock.forward."""
    B, T, D = x.shape
    base = 128 // math.gcd(D, 128)
    if block_b is None:
        block_b = _pick_block_b(B, T, D)
    block_b = max(base, -(-block_b // base) * base)   # keep column blocks lane-dense
    Bp = -(-B // block_b) * block_b                   # pad batch to a grid multiple
    grid_b = Bp // block_b
    ncol = block_b * D

    x_p = jnp.pad(x, ((0, Bp - B), (0, 0), (0, 0))) if Bp != B else x
    # (B, T, D) -> (T, B*D): a single lane-dense slab; Linear/softmax act on T.
    x2 = jnp.transpose(x_p, (1, 0, 2)).reshape(T, Bp * D)
    b_col = b.reshape(T, 1)

    vec2, probs2 = pl.pallas_call(
        _attention_kernel,
        out_shape=(
            jax.ShapeDtypeStruct((1, Bp * D), x.dtype),
            jax.ShapeDtypeStruct((T, Bp * D), x.dtype),
        ),
        grid_spec=pltpu.PrefetchScalarGridSpec(
            num_scalar_prefetch=0,
            grid=(grid_b,),
            in_specs=[
                pl.BlockSpec((T, ncol), lambda i: (0, i)),   # x slab per batch block
                # NOTE: for large T add pipeline_mode=pl.Buffered(1) on w/b (their
                # index_map is constant, so no double-buffer is needed); at T=8 the
                # duplicate copy is only a few hundred bytes.
                pl.BlockSpec((T, T), lambda i: (0, 0)),      # weight (broadcast)
                pl.BlockSpec((T, 1), lambda i: (0, 0)),      # bias   (broadcast)
            ],
            out_specs=[
                pl.BlockSpec((1, ncol), lambda i: (0, i)),   # vec slab (lane-dense)
                pl.BlockSpec((T, ncol), lambda i: (0, i)),   # probs slab (lane-dense)
            ],
        ),
        compiler_params=pltpu.CompilerParams(
            dimension_semantics=("parallel",),   # batch-parallel -> v7x's 2 TCs
            vmem_limit_bytes=32 * 1024 * 1024,
        ),
    )(x2, w, b_col)

    probs = jnp.transpose(probs2.reshape(T, Bp, D), (1, 0, 2))[:B]   # (B, T, D)
    vec = vec2.reshape(Bp, D)[:B]                                    # (B, D)
    return vec, probs


def reference(x, w, b):
    # Pure-JAX reference mirroring the PyTorch code exactly.
    x_t = jnp.transpose(x, (0, 2, 1))                  # (B, D, T)
    attn_w = jnp.einsum("bdt,st->bds", x_t, w) + b     # Linear: x @ W^T + b
    attn_p = jax.nn.softmax(attn_w, axis=-1)           # softmax over T
    attn_p = jnp.transpose(attn_p, (0, 2, 1))          # (B, T, D)
    attn_vec = jnp.sum(attn_p * x, axis=1)             # (B, D)
    return attn_vec, attn_p


if __name__ == "__main__":
    B, T, D = 32, 8, 32   # batch, time_step, feature dim

    key = jax.random.PRNGKey(0)
    kx, kw, kb = jax.random.split(key, 3)

    x = jax.random.normal(kx, (B, T, D), dtype=jnp.float32)
    # nn.Linear(T, T) default init: U(-1/sqrt(T), 1/sqrt(T)) for weight & bias.
    bound = 1.0 / (T ** 0.5)
    w = jax.random.uniform(kw, (T, T), minval=-bound, maxval=bound,
                           dtype=jnp.float32)
    bias = jax.random.uniform(kb, (T,), minval=-bound, maxval=bound,
                              dtype=jnp.float32)

    # block_b=8 -> 4 batch-parallel grid steps, each a lane-dense 256-wide slab.
    vec, probs = attention_block(x, w, bias, block_b=8)
    jax.block_until_ready((vec, probs))

    vec_ref, probs_ref = reference(x, w, bias)
    assert vec.shape == (B, D) and probs.shape == (B, T, D)
    # Tolerance accounts for the EUP approximate reciprocal in the softmax.
    assert jnp.allclose(vec, vec_ref, atol=5e-3, rtol=5e-3)
    assert jnp.allclose(probs, probs_ref, atol=5e-3, rtol=5e-3)

    print("KERNEL_OK")
</pallas_src>

<mosaic_0001>
module attributes {stable_mosaic.version = 11 : i64} {
  func.func @_attention_kernel(%arg0: i32, %arg1: memref<8x256xf32, #tpu.memory_space<vmem>>, %arg2: memref<8x8xf32, #tpu.memory_space<vmem>>, %arg3: memref<8x1xf32, #tpu.memory_space<vmem>>, %arg4: memref<1x256xf32, #tpu.memory_space<vmem>>, %arg5: memref<8x256xf32, #tpu.memory_space<vmem>>) attributes {dimension_semantics = [#tpu.dimension_semantics<parallel>], iteration_bounds = array<i64: 4>, scalar_prefetch = 0 : i64, scratch_operands = 0 : i64, tpu.core_type = #tpu.core_type<tc>, window_params = [{transform_indices = @transform_0, window_bounds = array<i64: 8, 256>}, {pipeline_mode = #tpu.pipeline_mode<synchronous>, transform_indices = @transform_1, window_bounds = array<i64: 8, 8>}, {pipeline_mode = #tpu.pipeline_mode<synchronous>, transform_indices = @transform_2, window_bounds = array<i64: 8, 1>}, {transform_indices = @transform_3, window_bounds = array<i64: 1, 256>}, {transform_indices = @transform_4, window_bounds = array<i64: 8, 256>}]} {
    %c0 = arith.constant 0 : index
    %c0_0 = arith.constant 0 : index
    %0 = vector.load %arg1[%c0, %c0_0] : memref<8x256xf32, #tpu.memory_space<vmem>>, vector<8x256xf32>
    %c0_1 = arith.constant 0 : index
    %c0_2 = arith.constant 0 : index
    %1 = vector.load %arg2[%c0_1, %c0_2] : memref<8x8xf32, #tpu.memory_space<vmem>>, vector<8x8xf32>
    %c0_3 = arith.constant 0 : index
    %c0_4 = arith.constant 0 : index
    %2 = vector.load %arg3[%c0_3, %c0_4] : memref<8x1xf32, #tpu.memory_space<vmem>>, vector<8x1xf32>
    %cst = arith.constant dense<0.000000e+00> : vector<8x256xf32>
    %3 = tpu.matmul %1, %0, %cst {dimension_numbers = #tpu.dot_dimension_numbers<[1], [0], [0], [1], [0, 0, 1, 1], [], []>} : vector<8x8xf32>, vector<8x256xf32>, vector<8x256xf32> -> vector<8x256xf32>
    %4 = vector.broadcast %2 : vector<8x1xf32> to vector<8x256xf32>
    %5 = arith.addf %3, %4 : vector<8x256xf32>
    %cst_5 = arith.constant dense<0xFF800000> : vector<256xf32>
    %6 = vector.multi_reduction <maximumf>, %5, %cst_5 [0] : vector<8x256xf32> to vector<256xf32>
    %7 = vector.shape_cast %6 : vector<256xf32> to vector<1x256xf32>
    %8 = vector.broadcast %7 : vector<1x256xf32> to vector<8x256xf32>
    %9 = arith.subf %5, %8 : vector<8x256xf32>
    %10 = math.exp %9 : vector<8x256xf32>
    %cst_6 = arith.constant dense<0.000000e+00> : vector<256xf32>
    %11 = vector.multi_reduction <add>, %10, %cst_6 [0] : vector<8x256xf32> to vector<256xf32>
    %12 = vector.shape_cast %11 : vector<256xf32> to vector<1x256xf32>
    %13 = tpu.reciprocal %12 {approx = true} : vector<1x256xf32> -> vector<1x256xf32>
    %14 = vector.broadcast %13 : vector<1x256xf32> to vector<8x256xf32>
    %15 = arith.mulf %10, %14 : vector<8x256xf32>
    %c0_7 = arith.constant 0 : index
    %c0_8 = arith.constant 0 : index
    %16 = vector.load %arg5[%c0_7, %c0_8] : memref<8x256xf32, #tpu.memory_space<vmem>>, vector<8x256xf32>
    tpu.vector_store %arg5[%c0_7, %c0_8], %15 {strides = array<i32>} : memref<8x256xf32, #tpu.memory_space<vmem>>, vector<8x256xf32>,
    %17 = arith.mulf %10, %0 : vector<8x256xf32>
    %cst_9 = arith.constant dense<0.000000e+00> : vector<256xf32>
    %18 = vector.multi_reduction <add>, %17, %cst_9 [0] : vector<8x256xf32> to vector<256xf32>
    %19 = vector.shape_cast %18 : vector<256xf32> to vector<1x256xf32>
    %20 = arith.mulf %19, %13 : vector<1x256xf32>
    %c0_10 = arith.constant 0 : index
    %c0_11 = arith.constant 0 : index
    %21 = vector.load %arg4[%c0_10, %c0_11] : memref<1x256xf32, #tpu.memory_space<vmem>>, vector<1x256xf32>
    tpu.vector_store %arg4[%c0_10, %c0_11], %20 {strides = array<i32>} : memref<1x256xf32, #tpu.memory_space<vmem>>, vector<1x256xf32>,
    return
  }
  func.func @transform_0(%arg0: i32) -> (i32, i32) {
    %c0_i32 = arith.constant 0 : i32
    %c0_i32_0 = arith.constant 0 : i32
    return %c0_i32, %arg0 : i32, i32
  }
  func.func @transform_1(%arg0: i32) -> (i32, i32) {
    %c0_i32 = arith.constant 0 : i32
    %c0_i32_0 = arith.constant 0 : i32
    %c0_i32_1 = arith.constant 0 : i32
    return %c0_i32, %c0_i32_0 : i32, i32
  }
  func.func @transform_2(%arg0: i32) -> (i32, i32) {
    %c0_i32 = arith.constant 0 : i32
    %c0_i32_0 = arith.constant 0 : i32
    %c0_i32_1 = arith.constant 0 : i32
    return %c0_i32, %c0_i32_0 : i32, i32
  }
  func.func @transform_3(%arg0: i32) -> (i32, i32) {
    %c0_i32 = arith.constant 0 : i32
    %c0_i32_0 = arith.constant 0 : i32
    return %c0_i32, %arg0 : i32, i32
  }
  func.func @transform_4(%arg0: i32) -> (i32, i32) {
    %c0_i32 = arith.constant 0 : i32
    %c0_i32_0 = arith.constant 0 : i32
    return %c0_i32, %arg0 : i32, i32
  }
}

</mosaic_0001>

<bundles_post_ra>
// kernel: attention_block.1
= control target key start
LH: loop header
LB: loop body
LE: loop exit
PB: predicated region body
PF: predicated region fallthrough
CT: control target
= control target key end

     0   :  { %s479_s15 = smov 0   ;;  %s513_s0 = inlined_call_operand.vmem [shape: f32[8,1024], index: 0, kind: input, shape index: {}]   ;;  %s514_s1 = inlined_call_operand.vmem [shape: f32[8,8], index: 1, kind: input, shape index: {}]   ;;  %s515_s2 = inlined_call_operand.vmem [shape: f32[8,1], index: 2, kind: input, shape index: {}]   ;;  %s516_s3 = inlined_call_operand.vmem [shape: f32[1,1024], index: 3, kind: output, shape index: {0}]   ;;  %s517_s4 = inlined_call_operand.vmem [shape: f32[8,1024], index: 4, kind: output, shape index: {1}]  }
   0x1 LB: > { %s413_s16 = sadd.s32 4294967295, %s451_s15   ;;  %p417_p0 = scmp.ge.s32.totalorder %s451_s15, 1  ;;  %s451_s15 = sphi %s479_s15, %s15_s15  }
   0x2   : > { %p166_p1 = scmp.lt.s32.totalorder %s451_s15, 5 }
   0x4   : > { %p167_p2 = pnand %p417_p0, %p166_p1 }
   0x5   : > { %s418_s17 = sshll.u32 (!%p167_p2), %s413_s16, 1 }
   0x6   : > { %170 = sbr.rel (%p167_p2) target bundleno = 193 (0xc1), region = 32  ;;  %p197_p3 = scmp.lt.s32.totalorder (!%p167_p2), %s418_s17, 7 }
   0xb   : > { %v216_v0 = vld [vmem:[%s515_s2] sm:$0xff]  ;;  %v453_v1 = vmov 0   ;;  %s519_s17 = smov (!%p197_p3, %s418_s17), 7  ;;  %vm222_vm0 = vcmask 64512   ;;  %v324_v54 = vlaneseq  ;;  %vm321_vm1 = vcmask 1040384  }
   0xc   : > { %436 = vset.pattern.permute.xlu0 %v453_v1  ;;  %s419_s20 = sshll.u32 %s519_s17, 3  ;;  %v215_v2 = vld [vmem:[%s514_s1] sm:$0xff]  ;;  %s205_s5 = scalar_lea.vmem %s516_s3, %s519_s17 }
   0xd   : > { %219 = vperm.xlu0 %436, %v216_v0   ;;  %s200_s23 = scalar_lea.vmem %s513_s0, %s419_s20  ;;  %s211_s28 = scalar_lea.vmem %s517_s4, %s419_s20  ;;  %vm326_vm2 = vcmp.lt.s32.totalorder %v324_v54, 256 }
   0xe   : > { %v213_v3 = vld [vmem:[%s200_s23] sm:$0xff]  ;;  %v214_v4 = vld [vmem:[%s200_s23 + $0x8] sm:$0xff] }
   0xf   : > { %241 = vmatpush.msra.mxu0 %v213_v3  ;;  %261 = vmatpush.msra.mxu1 %v214_v4 }
  0x10   : > { %423 = vmatmul.msk.f32.vlgmr.msra.gmra.mxu0 %vm222_vm0, %v215_v2  ;;  %424 = vmatmul.msk.f32.vlgmr.msra.gmra.mxu1 %vm222_vm0, %v215_v2 }
  0x7f   : > { %v220_v5 = vpop.permute.xlu0 %219 }
  0x8d   : > { %v243_v6 = vpop.f32.mrf.mxu0  ;;  %v263_v7 = vpop.f32.mrf.mxu1 }
  0x8e   : > { %v244_v8 = vadd.f32 %v243_v6, %v220_v5  ;;  %v264_v9 = vadd.f32 %v263_v7, %v220_v5 }
  0x90   : > { %v266_v10 = vrot.slane %v244_v8, 4  ;;  %v272_v11 = vrot.slane %v264_v9, 4 }
  0x92   : > { %v267_v12 = vmax.f32 %v244_v8, %v266_v10  ;;  %v273_v13 = vmax.f32 %v264_v9, %v272_v11 }
  0x94   : > { %v268_v14 = vrot.slane %v267_v12, 2  ;;  %v274_v15 = vrot.slane %v273_v13, 2 }
  0x96   : > { %v269_v16 = vmax.f32 %v267_v12, %v268_v14  ;;  %v275_v17 = vmax.f32 %v273_v13, %v274_v15 }
  0x98   : > { %v270_v18 = vrot.slane %v269_v16, 1  ;;  %v276_v19 = vrot.slane %v275_v17, 1 }
  0x9a   : > { %v271_v20 = vmax.f32 %v269_v16, %v270_v18  ;;  %v277_v21 = vmax.f32 %v275_v17, %v276_v19 }
  0x9c   : > { %v278_v22 = vsub.f32 %v244_v8, %v271_v20  ;;  %v279_v23 = vsub.f32 %v264_v9, %v277_v21 }
  0x9e   : > { %v280_v24 = vmul.f32 1.442695, %v278_v22  ;;  %v282_v25 = vmul.f32 1.442695, %v279_v23 }
  0xa0   : > { %437 = vpow2.f32 %v280_v24 }
  0xa1   : > { %439 = vpow2.f32 %v282_v25 }
  0xa6   : > { %v438_v26 = vpop.eup %437 }
  0xa7   : > { %v440_v27 = vpop.eup %439  ;;  %v284_v28 = vrot.slane %v438_v26, 4  ;;  %v302_v29 = vmul.f32 %v438_v26, %v213_v3 }
  0xa8   : > { %v290_v30 = vrot.slane %v440_v27, 4  ;;  %v303_v31 = vmul.f32 %v440_v27, %v214_v4 }
  0xa9   : > { %v285_v32 = vadd.f32 %v438_v26, %v284_v28  ;;  %v304_v33 = vrot.slane %v302_v29, 4 }
  0xaa   : > { %v291_v34 = vadd.f32 %v440_v27, %v290_v30  ;;  %v310_v35 = vrot.slane %v303_v31, 4 }
  0xab   : > { %v286_v36 = vrot.slane %v285_v32, 2  ;;  %v305_v37 = vadd.f32 %v304_v33, %v302_v29 }
  0xac   : > { %v292_v38 = vrot.slane %v291_v34, 2  ;;  %v311_v39 = vadd.f32 %v310_v35, %v303_v31 }
  0xad   : > { %v287_v40 = vadd.f32 %v286_v36, %v285_v32  ;;  %v306_v44 = vrot.slane %v305_v37, 2 }
  0xae   : > { %v293_v41 = vadd.f32 %v292_v38, %v291_v34  ;;  %v312_v42 = vrot.slane %v311_v39, 2 }
  0xaf   : > { %v288_v43 = vrot.slane %v287_v40, 1  ;;  %v307_v49 = vadd.f32 %v306_v44, %v305_v37 }
  0xb0   : > { %v294_v45 = vrot.slane %v293_v41, 1  ;;  %v313_v47 = vadd.f32 %v312_v42, %v311_v39 }
  0xb1   : > { %v289_v46 = vadd.f32 %v288_v43, %v287_v40  ;;  %v308_v51 = vrot.slane %v307_v49, 1 }
  0xb2   : > { %v295_v48 = vadd.f32 %v294_v45, %v293_v41  ;;  %v314_v50 = vrot.slane %v313_v47, 1 }
  0xb3   : > { %441 = vrcp.f32 %v289_v46  ;;  %v309_v57 = vadd.f32 %v308_v51, %v307_v49 }
  0xb4   : > { %443 = vrcp.f32 %v295_v48  ;;  %v315_v53 = vadd.f32 %v314_v50, %v313_v47 }
  0xb9   : > { %v442_v52 = vpop.eup %441 }
  0xba   : > { %v444_v55 = vpop.eup %443  ;;  %v298_v56 = vmul.f32 %v442_v52, %v438_v26  ;;  %v316_v60 = vmul.f32 %v442_v52, %v309_v57 }
  0xbb   : > { %v299_v58 = vmul.f32 %v444_v55, %v440_v27  ;;  %v317_v59 = vmul.f32 %v444_v55, %v315_v53 }
  0xbc   : > { %300 = vst [vmem:[%s211_s28] sm:$0xff] %v298_v56 }
  0xbd   : > { %301 = vst [vmem:[%s211_s28 + $0x8] sm:$0xff] %v299_v58  ;;  %v320_v61 = vrot.slane %v317_v59, 7 }
  0xbf   : > { %v322_v62 = vsel %vm321_vm1, %v316_v60, %v320_v61 }
  0xc0   : > { %328 = vst.msk [vmem:[%s205_s5] sm:$0x3] %vm326_vm2, %v322_v62 }
  0xc1 PF: > { %s15_s15 = sadd.s32 1, %s451_s15  }
  0xc2   : > { %p12_p4 = scmp.ge.s32.totalorder %s15_s15, 6  }
  0xc4   :  { %14 = sbr.rel (!%p12_p4) target bundleno = 1 (0x1), region = 74 }

</bundles_post_ra>
